<compile_context>
chip_gen: v7x
topology: tpu7x:2x2x1
jax: 0.10.0
libtpu: 0.0.40
codegen_flags: <defaults>
</compile_context>

<pallas_src>
import jax
import jax.numpy as jnp
from jax import lax
from jax.experimental import pallas as pl
from jax.experimental.pallas import tpu as pltpu
import numpy as np


def sentiment_gru_kernel(gi_ref, whh_pack_ref, wfcb_pack_ref, out_ref, feat_ref):
    """Whole forward pass in one kernel invocation (small shapes, no grid).

    gi_ref        : (T, B, 3H)  precomputed input-side gate pre-activations,
                                lanes ordered [r | z | n]; r,z include
                                b_ih+b_hh, n includes b_in.
    whh_pack_ref  : (H+8, 3H)   rows 0:H = W_hh^T (lanes [r|z|n]),
                                row H = [0 | 0 | b_hn], rest zero.
    wfcb_pack_ref : (2H+8, Cp)  rows 0:H = FC weight for max-pool half,
                                rows H:2H = mean-pool half, row 2H = b_fc
                                (lane-padded to Cp=128), rest zero.
    out_ref       : (B, Cp)     lane-dense output (sliced to C outside).
    feat_ref      : (B, 2H)     VMEM scratch for the [max | mean] feature.
    """
    T, B, H3 = gi_ref.shape
    H = H3 // 3
    H2 = 2 * H

    whh = whh_pack_ref[:H, :]              # (H, 3H)   hidden->gate weights
    bhn_row = whh_pack_ref[H:H + 1, :]     # (1, 3H)   zeros | zeros | b_hn
    wfc = wfcb_pack_ref[:H2, :]            # (2H, Cp)  [max-half ; mean-half]
    bfc = wfcb_pack_ref[H2:H2 + 1, :]      # (1, Cp)

    def step(t, carry):
        h, mx, sm = carry
        # Single MXU push on the serial dependency chain; b_hn only touches
        # the n lanes, so it can be folded into this broadcast add.
        gh = jnp.dot(h, whh, preferred_element_type=jnp.float32) + bhn_row
        gi = gi_ref[t]                                         # (B, 3H)
        rz = jax.nn.sigmoid(gi[:, :H2] + gh[:, :H2])           # r|z together
        r = rz[:, :H]
        z = rz[:, H:]
        n = jnp.tanh(gi[:, H2:] + r * gh[:, H2:])              # b_hn inside r*(.)
        h_new = (1.0 - z) * n + z * h
        return h_new, jnp.maximum(mx, h_new), sm + h_new

    h0 = jnp.zeros((B, H), jnp.float32)
    mx0 = jnp.full((B, H), -jnp.inf, jnp.float32)  # valid for T >= 1
    sm0 = jnp.zeros((B, H), jnp.float32)
    _, mx, sm = lax.fori_loop(0, T, step, (h0, mx0, sm0), unroll=True)

    # torch.cat([max, mean], 1) @ W_fc^T + b_fc  -> one (B,2H)@(2H,Cp) matmul.
    feat_ref[:, :H] = mx
    feat_ref[:, H:] = sm * (1.0 / T)
    out_ref[...] = (jnp.dot(feat_ref[...], wfc,
                            preferred_element_type=jnp.float32) + bfc)


def prepare_params(params, hidden_size, num_classes, c_pad=128):
    """One-time packing of all parameter-derived tensors (not per forward)."""
    H, C = hidden_size, num_classes
    H2, H3 = 2 * H, 3 * H
    b_ih = params["b_ih"].astype(jnp.float32)
    b_hh = params["b_hh"].astype(jnp.float32)

    # one_hot(x) @ W_ih^T == row gather of W_ih^T.  Fold the r/z (b_ih+b_hh)
    # and n (b_in) biases into every row so the gather alone yields gi.
    bias_fold = jnp.concatenate([b_ih[:H2] + b_hh[:H2], b_ih[H2:H3]])   # (3H,)
    w_ih_table = params["w_ih"].T.astype(jnp.float32) + bias_fold[None, :]

    # Packed hidden->gate weights: rows 0:H = W_hh^T, row H = [0 | 0 | b_hn].
    whh_pack = jnp.zeros((H + 8, H3), jnp.float32)
    whh_pack = whh_pack.at[:H, :].set(params["w_hh"].T.astype(jnp.float32))
    whh_pack = whh_pack.at[H, H2:].set(b_hh[H2:H3])

    # Packed FC: rows 0:H = max-half of W_fc^T, rows H:2H = mean-half,
    # row 2H = b_fc; lane-padded to c_pad for an unmasked, lane-dense output.
    wfc_t = params["w_fc"].T.astype(jnp.float32)                        # (2H, C)
    wfcb_pack = jnp.zeros((H2 + 8, c_pad), jnp.float32)
    wfcb_pack = wfcb_pack.at[:H2, :C].set(wfc_t)
    wfcb_pack = wfcb_pack.at[H2, :C].set(params["b_fc"].astype(jnp.float32))

    return {"w_ih_table": w_ih_table,
            "whh_pack": whh_pack,
            "wfcb_pack": wfcb_pack}


def sentiment_gru_forward(x_idx, prepped, hidden_size, num_classes):
    """Steady-state forward: one gather + one pallas_call (3 VMEM operands)."""
    B, T = x_idx.shape
    H = hidden_size
    C_PAD = prepped["wfcb_pack"].shape[1]

    # one_hot(x) @ W_ih^T with biases pre-folded == row gather of the table.
    # (jnp.take clips out-of-range ids; token ids are assumed in [0, V).)
    gi_all = jnp.take(prepped["w_ih_table"], x_idx, axis=0)     # (B, T, 3H)
    gi_all = jnp.transpose(gi_all, (1, 0, 2))                   # (T, B, 3H)

    vmem = pl.BlockSpec(memory_space=pltpu.MemorySpace.VMEM)
    out_pad = pl.pallas_call(
        sentiment_gru_kernel,
        out_shape=jax.ShapeDtypeStruct((B, C_PAD), jnp.float32),
        in_specs=[vmem, vmem, vmem],
        out_specs=vmem,
        scratch_shapes=[pltpu.VMEM((B, 2 * H), jnp.float32)],
    )(gi_all, prepped["whh_pack"], prepped["wfcb_pack"])
    return out_pad[:, :num_classes]


def reference_forward(x_idx, params, input_size, hidden_size, num_classes):
    """Pure-JAX reference reproducing nn.GRU + pooling + Linear semantics."""
    B, T = x_idx.shape
    H = hidden_size
    x = jax.nn.one_hot(x_idx, input_size, dtype=jnp.float32)     # (B, T, V)
    w_ih, w_hh = params["w_ih"], params["w_hh"]                  # (3H,V),(3H,H)
    b_ih, b_hh = params["b_ih"], params["b_hh"]
    h = jnp.zeros((B, H), jnp.float32)
    outs = []
    for t in range(T):
        gi = x[:, t, :] @ w_ih.T + b_ih
        gh = h @ w_hh.T + b_hh
        r = jax.nn.sigmoid(gi[:, :H] + gh[:, :H])
        z = jax.nn.sigmoid(gi[:, H:2 * H] + gh[:, H:2 * H])
        n = jnp.tanh(gi[:, 2 * H:] + r * gh[:, 2 * H:])
        h = (1.0 - z) * n + z * h
        outs.append(h)
    out = jnp.stack(outs, axis=1)                                # (B, T, H)
    feat = jnp.concatenate([out.max(axis=1), out.mean(axis=1)], axis=1)
    return feat @ params["w_fc"].T + params["b_fc"]


def init_params(key, input_size, hidden_size, num_classes):
    """Deterministic init (uniform(-1/sqrt(H), 1/sqrt(H)), PyTorch-style)."""
    H, V, C = hidden_size, input_size, num_classes
    k = 1.0 / np.sqrt(H)
    keys = jax.random.split(key, 6)
    u = lambda kk, shape: jax.random.uniform(kk, shape, jnp.float32, -k, k)
    return {
        "w_ih": u(keys[0], (3 * H, V)),
        "w_hh": u(keys[1], (3 * H, H)),
        "b_ih": u(keys[2], (3 * H,)),
        "b_hh": u(keys[3], (3 * H,)),
        # factor = 2 for bi=False: fc input is cat([max, mean]) = 2H
        "w_fc": u(keys[4], (C, 2 * H)),
        "b_fc": u(keys[5], (C,)),
    }


if __name__ == "__main__":
    INPUT_SIZE = 64    # vocab / one-hot width
    HIDDEN = 32
    NUM_CLASSES = 4
    BATCH = 8          # multiple of 8 -> fills the TPU sublane axis (perf review)
    SEQ = 8

    key = jax.random.PRNGKey(0)
    k_params, k_x = jax.random.split(key)
    params = init_params(k_params, INPUT_SIZE, HIDDEN, NUM_CLASSES)
    x_idx = jax.random.randint(k_x, (BATCH, SEQ), 0, INPUT_SIZE, dtype=jnp.int32)

    # Parameter-derived tensors built once, outside the steady-state path.
    prepped = prepare_params(params, HIDDEN, NUM_CLASSES)

    fwd = jax.jit(sentiment_gru_forward, static_argnums=(2, 3))
    out = jax.block_until_ready(fwd(x_idx, prepped, HIDDEN, NUM_CLASSES))

    ref = jax.block_until_ready(
        reference_forward(x_idx, params, INPUT_SIZE, HIDDEN, NUM_CLASSES))
    np.testing.assert_allclose(np.asarray(out), np.asarray(ref),
                               rtol=1e-4, atol=1e-4)
    print("KERNEL_OK")
</pallas_src>

<mosaic_0001>
module attributes {stable_mosaic.version = 11 : i64} {
  func.func @sentiment_gru_kernel(%arg0: memref<8x8x96xf32, #tpu.memory_space<vmem>>, %arg1: memref<40x96xf32, #tpu.memory_space<vmem>>, %arg2: memref<72x128xf32, #tpu.memory_space<vmem>>, %arg3: memref<8x128xf32, #tpu.memory_space<vmem>>, %arg4: memref<8x64xf32, #tpu.memory_space<vmem>>) attributes {dimension_semantics = [], scalar_prefetch = 0 : i64, scratch_operands = 1 : i64, tpu.core_type = #tpu.core_type<tc>} {
    %c0 = arith.constant 0 : index
    %c0_0 = arith.constant 0 : index
    %0 = vector.load %arg1[%c0, %c0_0] : memref<40x96xf32, #tpu.memory_space<vmem>>, vector<32x96xf32>
    %c32 = arith.constant 32 : index
    %c0_1 = arith.constant 0 : index
    %1 = vector.load %arg1[%c32, %c0_1] : memref<40x96xf32, #tpu.memory_space<vmem>>, vector<1x96xf32>
    %c0_2 = arith.constant 0 : index
    %c0_3 = arith.constant 0 : index
    %2 = vector.load %arg2[%c0_2, %c0_3] : memref<72x128xf32, #tpu.memory_space<vmem>>, vector<64x128xf32>
    %c64 = arith.constant 64 : index
    %c0_4 = arith.constant 0 : index
    %3 = vector.load %arg2[%c64, %c0_4] : memref<72x128xf32, #tpu.memory_space<vmem>>, vector<1x128xf32>
    %cst = arith.constant 0.000000e+00 : f32
    %4 = vector.broadcast %cst : f32 to vector<8x32xf32>
    %cst_5 = arith.constant 0xFF800000 : f32
    %5 = vector.broadcast %cst_5 : f32 to vector<8x32xf32>
    %cst_6 = arith.constant 0.000000e+00 : f32
    %6 = vector.broadcast %cst_6 : f32 to vector<8x32xf32>
    %c0_i32 = arith.constant 0 : i32
    %cst_7 = arith.constant dense<0.000000e+00> : vector<8x96xf32>
    %7 = tpu.matmul %4, %0, %cst_7 {dimension_numbers = #tpu.dot_dimension_numbers<[1], [0], [0], [1], [0, 0, 1, 1], [], []>} : vector<8x32xf32>, vector<32x96xf32>, vector<8x96xf32> -> vector<8x96xf32>
    %8 = vector.broadcast %1 : vector<1x96xf32> to vector<8x96xf32>
    %9 = arith.addf %7, %8 : vector<8x96xf32>
    %10 = arith.index_cast %c0_i32 : i32 to index
    %c0_8 = arith.constant 0 : index
    %c0_9 = arith.constant 0 : index
    %11 = vector.load %arg0[%10, %c0_8, %c0_9] : memref<8x8x96xf32, #tpu.memory_space<vmem>>, vector<1x8x96xf32>
    %12 = vector.shape_cast %11 : vector<1x8x96xf32> to vector<8x96xf32>
    %13 = vector.extract_strided_slice %12 {offsets = [0, 0], sizes = [8, 64], strides = [1, 1]} : vector<8x96xf32> to vector<8x64xf32>
    %14 = vector.extract_strided_slice %9 {offsets = [0, 0], sizes = [8, 64], strides = [1, 1]} : vector<8x96xf32> to vector<8x64xf32>
    %15 = arith.addf %13, %14 : vector<8x64xf32>
    %16 = arith.negf %15 : vector<8x64xf32>
    %17 = math.exp %16 : vector<8x64xf32>
    %cst_10 = arith.constant 1.000000e+00 : f32
    %18 = vector.broadcast %cst_10 : f32 to vector<8x64xf32>
    %19 = arith.addf %18, %17 : vector<8x64xf32>
    %20 = arith.divf %18, %19 : vector<8x64xf32>
    %21 = vector.extract_strided_slice %20 {offsets = [0, 0], sizes = [8, 32], strides = [1, 1]} : vector<8x64xf32> to vector<8x32xf32>
    %22 = vector.extract_strided_slice %20 {offsets = [0, 32], sizes = [8, 32], strides = [1, 1]} : vector<8x64xf32> to vector<8x32xf32>
    %23 = vector.extract_strided_slice %12 {offsets = [0, 64], sizes = [8, 32], strides = [1, 1]} : vector<8x96xf32> to vector<8x32xf32>
    %24 = vector.extract_strided_slice %9 {offsets = [0, 64], sizes = [8, 32], strides = [1, 1]} : vector<8x96xf32> to vector<8x32xf32>
    %25 = arith.mulf %21, %24 : vector<8x32xf32>
    %26 = arith.addf %23, %25 : vector<8x32xf32>
    %27 = math.tanh %26 : vector<8x32xf32>
    %cst_11 = arith.constant 1.000000e+00 : f32
    %28 = vector.broadcast %cst_11 : f32 to vector<8x32xf32>
    %29 = arith.subf %28, %22 : vector<8x32xf32>
    %30 = arith.mulf %29, %27 : vector<8x32xf32>
    %31 = arith.mulf %22, %4 : vector<8x32xf32>
    %32 = arith.addf %30, %31 : vector<8x32xf32>
    %33 = arith.maximumf %5, %32 : vector<8x32xf32>
    %34 = arith.addf %6, %32 : vector<8x32xf32>
    %c1_i32 = arith.constant 1 : i32
    %cst_12 = arith.constant dense<0.000000e+00> : vector<8x96xf32>
    %35 = tpu.matmul %32, %0, %cst_12 {dimension_numbers = #tpu.dot_dimension_numbers<[1], [0], [0], [1], [0, 0, 1, 1], [], []>} : vector<8x32xf32>, vector<32x96xf32>, vector<8x96xf32> -> vector<8x96xf32>
    %36 = vector.broadcast %1 : vector<1x96xf32> to vector<8x96xf32>
    %37 = arith.addf %35, %36 : vector<8x96xf32>
    %38 = arith.index_cast %c1_i32 : i32 to index
    %c0_13 = arith.constant 0 : index
    %c0_14 = arith.constant 0 : index
    %39 = vector.load %arg0[%38, %c0_13, %c0_14] : memref<8x8x96xf32, #tpu.memory_space<vmem>>, vector<1x8x96xf32>
    %40 = vector.shape_cast %39 : vector<1x8x96xf32> to vector<8x96xf32>
    %41 = vector.extract_strided_slice %40 {offsets = [0, 0], sizes = [8, 64], strides = [1, 1]} : vector<8x96xf32> to vector<8x64xf32>
    %42 = vector.extract_strided_slice %37 {offsets = [0, 0], sizes = [8, 64], strides = [1, 1]} : vector<8x96xf32> to vector<8x64xf32>
    %43 = arith.addf %41, %42 : vector<8x64xf32>
    %44 = arith.negf %43 : vector<8x64xf32>
    %45 = math.exp %44 : vector<8x64xf32>
    %cst_15 = arith.constant 1.000000e+00 : f32
    %46 = vector.broadcast %cst_15 : f32 to vector<8x64xf32>
    %47 = arith.addf %46, %45 : vector<8x64xf32>
    %48 = arith.divf %46, %47 : vector<8x64xf32>
    %49 = vector.extract_strided_slice %48 {offsets = [0, 0], sizes = [8, 32], strides = [1, 1]} : vector<8x64xf32> to vector<8x32xf32>
    %50 = vector.extract_strided_slice %48 {offsets = [0, 32], sizes = [8, 32], strides = [1, 1]} : vector<8x64xf32> to vector<8x32xf32>
    %51 = vector.extract_strided_slice %40 {offsets = [0, 64], sizes = [8, 32], strides = [1, 1]} : vector<8x96xf32> to vector<8x32xf32>
    %52 = vector.extract_strided_slice %37 {offsets = [0, 64], sizes = [8, 32], strides = [1, 1]} : vector<8x96xf32> to vector<8x32xf32>
    %53 = arith.mulf %49, %52 : vector<8x32xf32>
    %54 = arith.addf %51, %53 : vector<8x32xf32>
    %55 = math.tanh %54 : vector<8x32xf32>
    %cst_16 = arith.constant 1.000000e+00 : f32
    %56 = vector.broadcast %cst_16 : f32 to vector<8x32xf32>
    %57 = arith.subf %56, %50 : vector<8x32xf32>
    %58 = arith.mulf %57, %55 : vector<8x32xf32>
    %59 = arith.mulf %50, %32 : vector<8x32xf32>
    %60 = arith.addf %58, %59 : vector<8x32xf32>
    %61 = arith.maximumf %33, %60 : vector<8x32xf32>
    %62 = arith.addf %34, %60 : vector<8x32xf32>
    %c2_i32 = arith.constant 2 : i32
    %cst_17 = arith.constant dense<0.000000e+00> : vector<8x96xf32>
    %63 = tpu.matmul %60, %0, %cst_17 {dimension_numbers = #tpu.dot_dimension_numbers<[1], [0], [0], [1], [0, 0, 1, 1], [], []>} : vector<8x32xf32>, vector<32x96xf32>, vector<8x96xf32> -> vector<8x96xf32>
    %64 = vector.broadcast %1 : vector<1x96xf32> to vector<8x96xf32>
    %65 = arith.addf %63, %64 : vector<8x96xf32>
    %66 = arith.index_cast %c2_i32 : i32 to index
    %c0_18 = arith.constant 0 : index
    %c0_19 = arith.constant 0 : index
    %67 = vector.load %arg0[%66, %c0_18, %c0_19] : memref<8x8x96xf32, #tpu.memory_space<vmem>>, vector<1x8x96xf32>
    %68 = vector.shape_cast %67 : vector<1x8x96xf32> to vector<8x96xf32>
    %69 = vector.extract_strided_slice %68 {offsets = [0, 0], sizes = [8, 64], strides = [1, 1]} : vector<8x96xf32> to vector<8x64xf32>
    %70 = vector.extract_strided_slice %65 {offsets = [0, 0], sizes = [8, 64], strides = [1, 1]} : vector<8x96xf32> to vector<8x64xf32>
    %71 = arith.addf %69, %70 : vector<8x64xf32>
    %72 = arith.negf %71 : vector<8x64xf32>
    %73 = math.exp %72 : vector<8x64xf32>
    %cst_20 = arith.constant 1.000000e+00 : f32
    %74 = vector.broadcast %cst_20 : f32 to vector<8x64xf32>
    %75 = arith.addf %74, %73 : vector<8x64xf32>
    %76 = arith.divf %74, %75 : vector<8x64xf32>
    %77 = vector.extract_strided_slice %76 {offsets = [0, 0], sizes = [8, 32], strides = [1, 1]} : vector<8x64xf32> to vector<8x32xf32>
    %78 = vector.extract_strided_slice %76 {offsets = [0, 32], sizes = [8, 32], strides = [1, 1]} : vector<8x64xf32> to vector<8x32xf32>
    %79 = vector.extract_strided_slice %68 {offsets = [0, 64], sizes = [8, 32], strides = [1, 1]} : vector<8x96xf32> to vector<8x32xf32>
    %80 = vector.extract_strided_slice %65 {offsets = [0, 64], sizes = [8, 32], strides = [1, 1]} : vector<8x96xf32> to vector<8x32xf32>
    %81 = arith.mulf %77, %80 : vector<8x32xf32>
    %82 = arith.addf %79, %81 : vector<8x32xf32>
    %83 = math.tanh %82 : vector<8x32xf32>
    %cst_21 = arith.constant 1.000000e+00 : f32
    %84 = vector.broadcast %cst_21 : f32 to vector<8x32xf32>
    %85 = arith.subf %84, %78 : vector<8x32xf32>
    %86 = arith.mulf %85, %83 : vector<8x32xf32>
    %87 = arith.mulf %78, %60 : vector<8x32xf32>
    %88 = arith.addf %86, %87 : vector<8x32xf32>
    %89 = arith.maximumf %61, %88 : vector<8x32xf32>
    %90 = arith.addf %62, %88 : vector<8x32xf32>
    %c3_i32 = arith.constant 3 : i32
    %cst_22 = arith.constant dense<0.000000e+00> : vector<8x96xf32>
    %91 = tpu.matmul %88, %0, %cst_22 {dimension_numbers = #tpu.dot_dimension_numbers<[1], [0], [0], [1], [0, 0, 1, 1], [], []>} : vector<8x32xf32>, vector<32x96xf32>, vector<8x96xf32> -> vector<8x96xf32>
    %92 = vector.broadcast %1 : vector<1x96xf32> to vector<8x96xf32>
    %93 = arith.addf %91, %92 : vector<8x96xf32>
    %94 = arith.index_cast %c3_i32 : i32 to index
    %c0_23 = arith.constant 0 : index
    %c0_24 = arith.constant 0 : index
    %95 = vector.load %arg0[%94, %c0_23, %c0_24] : memref<8x8x96xf32, #tpu.memory_space<vmem>>, vector<1x8x96xf32>
    %96 = vector.shape_cast %95 : vector<1x8x96xf32> to vector<8x96xf32>
    %97 = vector.extract_strided_slice %96 {offsets = [0, 0], sizes = [8, 64], strides = [1, 1]} : vector<8x96xf32> to vector<8x64xf32>
    %98 = vector.extract_strided_slice %93 {offsets = [0, 0], sizes = [8, 64], strides = [1, 1]} : vector<8x96xf32> to vector<8x64xf32>
    %99 = arith.addf %97, %98 : vector<8x64xf32>
    %100 = arith.negf %99 : vector<8x64xf32>
    %101 = math.exp %100 : vector<8x64xf32>
    %cst_25 = arith.constant 1.000000e+00 : f32
    %102 = vector.broadcast %cst_25 : f32 to vector<8x64xf32>
    %103 = arith.addf %102, %101 : vector<8x64xf32>
    %104 = arith.divf %102, %103 : vector<8x64xf32>
    %105 = vector.extract_strided_slice %104 {offsets = [0, 0], sizes = [8, 32], strides = [1, 1]} : vector<8x64xf32> to vector<8x32xf32>
    %106 = vector.extract_strided_slice %104 {offsets = [0, 32], sizes = [8, 32], strides = [1, 1]} : vector<8x64xf32> to vector<8x32xf32>
    %107 = vector.extract_strided_slice %96 {offsets = [0, 64], sizes = [8, 32], strides = [1, 1]} : vector<8x96xf32> to vector<8x32xf32>
    %108 = vector.extract_strided_slice %93 {offsets = [0, 64], sizes = [8, 32], strides = [1, 1]} : vector<8x96xf32> to vector<8x32xf32>
    %109 = arith.mulf %105, %108 : vector<8x32xf32>
    %110 = arith.addf %107, %109 : vector<8x32xf32>
    %111 = math.tanh %110 : vector<8x32xf32>
    %cst_26 = arith.constant 1.000000e+00 : f32
    %112 = vector.broadcast %cst_26 : f32 to vector<8x32xf32>
    %113 = arith.subf %112, %106 : vector<8x32xf32>
    %114 = arith.mulf %113, %111 : vector<8x32xf32>
    %115 = arith.mulf %106, %88 : vector<8x32xf32>
    %116 = arith.addf %114, %115 : vector<8x32xf32>
    %117 = arith.maximumf %89, %116 : vector<8x32xf32>
    %118 = arith.addf %90, %116 : vector<8x32xf32>
    %c4_i32 = arith.constant 4 : i32
    %cst_27 = arith.constant dense<0.000000e+00> : vector<8x96xf32>
    %119 = tpu.matmul %116, %0, %cst_27 {dimension_numbers = #tpu.dot_dimension_numbers<[1], [0], [0], [1], [0, 0, 1, 1], [], []>} : vector<8x32xf32>, vector<32x96xf32>, vector<8x96xf32> -> vector<8x96xf32>
    %120 = vector.broadcast %1 : vector<1x96xf32> to vector<8x96xf32>
    %121 = arith.addf %119, %120 : vector<8x96xf32>
    %122 = arith.index_cast %c4_i32 : i32 to index
    %c0_28 = arith.constant 0 : index
    %c0_29 = arith.constant 0 : index
    %123 = vector.load %arg0[%122, %c0_28, %c0_29] : memref<8x8x96xf32, #tpu.memory_space<vmem>>, vector<1x8x96xf32>
    %124 = vector.shape_cast %123 : vector<1x8x96xf32> to vector<8x96xf32>
    %125 = vector.extract_strided_slice %124 {offsets = [0, 0], sizes = [8, 64], strides = [1, 1]} : vector<8x96xf32> to vector<8x64xf32>
    %126 = vector.extract_strided_slice %121 {offsets = [0, 0], sizes = [8, 64], strides = [1, 1]} : vector<8x96xf32> to vector<8x64xf32>
    %127 = arith.addf %125, %126 : vector<8x64xf32>
    %128 = arith.negf %127 : vector<8x64xf32>
    %129 = math.exp %128 : vector<8x64xf32>
    %cst_30 = arith.constant 1.000000e+00 : f32
    %130 = vector.broadcast %cst_30 : f32 to vector<8x64xf32>
    %131 = arith.addf %130, %129 : vector<8x64xf32>
    %132 = arith.divf %130, %131 : vector<8x64xf32>
    %133 = vector.extract_strided_slice %132 {offsets = [0, 0], sizes = [8, 32], strides = [1, 1]} : vector<8x64xf32> to vector<8x32xf32>
    %134 = vector.extract_strided_slice %132 {offsets = [0, 32], sizes = [8, 32], strides = [1, 1]} : vector<8x64xf32> to vector<8x32xf32>
    %135 = vector.extract_strided_slice %124 {offsets = [0, 64], sizes = [8, 32], strides = [1, 1]} : vector<8x96xf32> to vector<8x32xf32>
    %136 = vector.extract_strided_slice %121 {offsets = [0, 64], sizes = [8, 32], strides = [1, 1]} : vector<8x96xf32> to vector<8x32xf32>
    %137 = arith.mulf %133, %136 : vector<8x32xf32>
    %138 = arith.addf %135, %137 : vector<8x32xf32>
    %139 = math.tanh %138 : vector<8x32xf32>
    %cst_31 = arith.constant 1.000000e+00 : f32
    %140 = vector.broadcast %cst_31 : f32 to vector<8x32xf32>
    %141 = arith.subf %140, %134 : vector<8x32xf32>
    %142 = arith.mulf %141, %139 : vector<8x32xf32>
    %143 = arith.mulf %134, %116 : vector<8x32xf32>
    %144 = arith.addf %142, %143 : vector<8x32xf32>
    %145 = arith.maximumf %117, %144 : vector<8x32xf32>
    %146 = arith.addf %118, %144 : vector<8x32xf32>
    %c5_i32 = arith.constant 5 : i32
    %cst_32 = arith.constant dense<0.000000e+00> : vector<8x96xf32>
    %147 = tpu.matmul %144, %0, %cst_32 {dimension_numbers = #tpu.dot_dimension_numbers<[1], [0], [0], [1], [0, 0, 1, 1], [], []>} : vector<8x32xf32>, vector<32x96xf32>, vector<8x96xf32> -> vector<8x96xf32>
    %148 = vector.broadcast %1 : vector<1x96xf32> to vector<8x96xf32>
    %149 = arith.addf %147, %148 : vector<8x96xf32>
    %150 = arith.index_cast %c5_i32 : i32 to index
    %c0_33 = arith.constant 0 : index
    %c0_34 = arith.constant 0 : index
    %151 = vector.load %arg0[%150, %c0_33, %c0_34] : memref<8x8x96xf32, #tpu.memory_space<vmem>>, vector<1x8x96xf32>
    %152 = vector.shape_cast %151 : vector<1x8x96xf32> to vector<8x96xf32>
    %153 = vector.extract_strided_slice %152 {offsets = [0, 0], sizes = [8, 64], strides = [1, 1]} : vector<8x96xf32> to vector<8x64xf32>
    %154 = vector.extract_strided_slice %149 {offsets = [0, 0], sizes = [8, 64], strides = [1, 1]} : vector<8x96xf32> to vector<8x64xf32>
    %155 = arith.addf %153, %154 : vector<8x64xf32>
    %156 = arith.negf %155 : vector<8x64xf32>
    %157 = math.exp %156 : vector<8x64xf32>
    %cst_35 = arith.constant 1.000000e+00 : f32
    %158 = vector.broadcast %cst_35 : f32 to vector<8x64xf32>
    %159 = arith.addf %158, %157 : vector<8x64xf32>
    %160 = arith.divf %158, %159 : vector<8x64xf32>
    %161 = vector.extract_strided_slice %160 {offsets = [0, 0], sizes = [8, 32], strides = [1, 1]} : vector<8x64xf32> to vector<8x32xf32>
    %162 = vector.extract_strided_slice %160 {offsets = [0, 32], sizes = [8, 32], strides = [1, 1]} : vector<8x64xf32> to vector<8x32xf32>
    %163 = vector.extract_strided_slice %152 {offsets = [0, 64], sizes = [8, 32], strides = [1, 1]} : vector<8x96xf32> to vector<8x32xf32>
    %164 = vector.extract_strided_slice %149 {offsets = [0, 64], sizes = [8, 32], strides = [1, 1]} : vector<8x96xf32> to vector<8x32xf32>
    %165 = arith.mulf %161, %164 : vector<8x32xf32>
    %166 = arith.addf %163, %165 : vector<8x32xf32>
    %167 = math.tanh %166 : vector<8x32xf32>
    %cst_36 = arith.constant 1.000000e+00 : f32
    %168 = vector.broadcast %cst_36 : f32 to vector<8x32xf32>
    %169 = arith.subf %168, %162 : vector<8x32xf32>
    %170 = arith.mulf %169, %167 : vector<8x32xf32>
    %171 = arith.mulf %162, %144 : vector<8x32xf32>
    %172 = arith.addf %170, %171 : vector<8x32xf32>
    %173 = arith.maximumf %145, %172 : vector<8x32xf32>
    %174 = arith.addf %146, %172 : vector<8x32xf32>
    %c6_i32 = arith.constant 6 : i32
    %cst_37 = arith.constant dense<0.000000e+00> : vector<8x96xf32>
    %175 = tpu.matmul %172, %0, %cst_37 {dimension_numbers = #tpu.dot_dimension_numbers<[1], [0], [0], [1], [0, 0, 1, 1], [], []>} : vector<8x32xf32>, vector<32x96xf32>, vector<8x96xf32> -> vector<8x96xf32>
    %176 = vector.broadcast %1 : vector<1x96xf32> to vector<8x96xf32>
    %177 = arith.addf %175, %176 : vector<8x96xf32>
    %178 = arith.index_cast %c6_i32 : i32 to index
    %c0_38 = arith.constant 0 : index
    %c0_39 = arith.constant 0 : index
    %179 = vector.load %arg0[%178, %c0_38, %c0_39] : memref<8x8x96xf32, #tpu.memory_space<vmem>>, vector<1x8x96xf32>
    %180 = vector.shape_cast %179 : vector<1x8x96xf32> to vector<8x96xf32>
    %181 = vector.extract_strided_slice %180 {offsets = [0, 0], sizes = [8, 64], strides = [1, 1]} : vector<8x96xf32> to vector<8x64xf32>
    %182 = vector.extract_strided_slice %177 {offsets = [0, 0], sizes = [8, 64], strides = [1, 1]} : vector<8x96xf32> to vector<8x64xf32>
    %183 = arith.addf %181, %182 : vector<8x64xf32>
    %184 = arith.negf %183 : vector<8x64xf32>
    %185 = math.exp %184 : vector<8x64xf32>
    %cst_40 = arith.constant 1.000000e+00 : f32
    %186 = vector.broadcast %cst_40 : f32 to vector<8x64xf32>
    %187 = arith.addf %186, %185 : vector<8x64xf32>
    %188 = arith.divf %186, %187 : vector<8x64xf32>
    %189 = vector.extract_strided_slice %188 {offsets = [0, 0], sizes = [8, 32], strides = [1, 1]} : vector<8x64xf32> to vector<8x32xf32>
    %190 = vector.extract_strided_slice %188 {offsets = [0, 32], sizes = [8, 32], strides = [1, 1]} : vector<8x64xf32> to vector<8x32xf32>
    %191 = vector.extract_strided_slice %180 {offsets = [0, 64], sizes = [8, 32], strides = [1, 1]} : vector<8x96xf32> to vector<8x32xf32>
    %192 = vector.extract_strided_slice %177 {offsets = [0, 64], sizes = [8, 32], strides = [1, 1]} : vector<8x96xf32> to vector<8x32xf32>
    %193 = arith.mulf %189, %192 : vector<8x32xf32>
    %194 = arith.addf %191, %193 : vector<8x32xf32>
    %195 = math.tanh %194 : vector<8x32xf32>
    %cst_41 = arith.constant 1.000000e+00 : f32
    %196 = vector.broadcast %cst_41 : f32 to vector<8x32xf32>
    %197 = arith.subf %196, %190 : vector<8x32xf32>
    %198 = arith.mulf %197, %195 : vector<8x32xf32>
    %199 = arith.mulf %190, %172 : vector<8x32xf32>
    %200 = arith.addf %198, %199 : vector<8x32xf32>
    %201 = arith.maximumf %173, %200 : vector<8x32xf32>
    %202 = arith.addf %174, %200 : vector<8x32xf32>
    %c7_i32 = arith.constant 7 : i32
    %cst_42 = arith.constant dense<0.000000e+00> : vector<8x96xf32>
    %203 = tpu.matmul %200, %0, %cst_42 {dimension_numbers = #tpu.dot_dimension_numbers<[1], [0], [0], [1], [0, 0, 1, 1], [], []>} : vector<8x32xf32>, vector<32x96xf32>, vector<8x96xf32> -> vector<8x96xf32>
    %204 = vector.broadcast %1 : vector<1x96xf32> to vector<8x96xf32>
    %205 = arith.addf %203, %204 : vector<8x96xf32>
    %206 = arith.index_cast %c7_i32 : i32 to index
    %c0_43 = arith.constant 0 : index
    %c0_44 = arith.constant 0 : index
    %207 = vector.load %arg0[%206, %c0_43, %c0_44] : memref<8x8x96xf32, #tpu.memory_space<vmem>>, vector<1x8x96xf32>
    %208 = vector.shape_cast %207 : vector<1x8x96xf32> to vector<8x96xf32>
    %209 = vector.extract_strided_slice %208 {offsets = [0, 0], sizes = [8, 64], strides = [1, 1]} : vector<8x96xf32> to vector<8x64xf32>
    %210 = vector.extract_strided_slice %205 {offsets = [0, 0], sizes = [8, 64], strides = [1, 1]} : vector<8x96xf32> to vector<8x64xf32>
    %211 = arith.addf %209, %210 : vector<8x64xf32>
    %212 = arith.negf %211 : vector<8x64xf32>
    %213 = math.exp %212 : vector<8x64xf32>
    %cst_45 = arith.constant 1.000000e+00 : f32
    %214 = vector.broadcast %cst_45 : f32 to vector<8x64xf32>
    %215 = arith.addf %214, %213 : vector<8x64xf32>
    %216 = arith.divf %214, %215 : vector<8x64xf32>
    %217 = vector.extract_strided_slice %216 {offsets = [0, 0], sizes = [8, 32], strides = [1, 1]} : vector<8x64xf32> to vector<8x32xf32>
    %218 = vector.extract_strided_slice %216 {offsets = [0, 32], sizes = [8, 32], strides = [1, 1]} : vector<8x64xf32> to vector<8x32xf32>
    %219 = vector.extract_strided_slice %208 {offsets = [0, 64], sizes = [8, 32], strides = [1, 1]} : vector<8x96xf32> to vector<8x32xf32>
    %220 = vector.extract_strided_slice %205 {offsets = [0, 64], sizes = [8, 32], strides = [1, 1]} : vector<8x96xf32> to vector<8x32xf32>
    %221 = arith.mulf %217, %220 : vector<8x32xf32>
    %222 = arith.addf %219, %221 : vector<8x32xf32>
    %223 = math.tanh %222 : vector<8x32xf32>
    %cst_46 = arith.constant 1.000000e+00 : f32
    %224 = vector.broadcast %cst_46 : f32 to vector<8x32xf32>
    %225 = arith.subf %224, %218 : vector<8x32xf32>
    %226 = arith.mulf %225, %223 : vector<8x32xf32>
    %227 = arith.mulf %218, %200 : vector<8x32xf32>
    %228 = arith.addf %226, %227 : vector<8x32xf32>
    %229 = arith.maximumf %201, %228 : vector<8x32xf32>
    %230 = arith.addf %202, %228 : vector<8x32xf32>
    %c8_i32 = arith.constant 8 : i32
    %c0_47 = arith.constant 0 : index
    %c0_48 = arith.constant 0 : index
    %231 = vector.load %arg4[%c0_47, %c0_48] : memref<8x64xf32, #tpu.memory_space<vmem>>, vector<8x32xf32>
    tpu.vector_store %arg4[%c0_47, %c0_48], %229 {strides = array<i32>} : memref<8x64xf32, #tpu.memory_space<vmem>>, vector<8x32xf32>,
    %cst_49 = arith.constant 1.250000e-01 : f32
    %232 = vector.broadcast %cst_49 : f32 to vector<8x32xf32>
    %233 = arith.mulf %230, %232 : vector<8x32xf32>
    %c0_50 = arith.constant 0 : index
    %c32_51 = arith.constant 32 : index
    %234 = vector.load %arg4[%c0_50, %c32_51] : memref<8x64xf32, #tpu.memory_space<vmem>>, vector<8x32xf32>
    tpu.vector_store %arg4[%c0_50, %c32_51], %233 {strides = array<i32>} : memref<8x64xf32, #tpu.memory_space<vmem>>, vector<8x32xf32>,
    %c0_52 = arith.constant 0 : index
    %c0_53 = arith.constant 0 : index
    %235 = vector.load %arg4[%c0_52, %c0_53] : memref<8x64xf32, #tpu.memory_space<vmem>>, vector<8x64xf32>
    %cst_54 = arith.constant dense<0.000000e+00> : vector<8x128xf32>
    %236 = tpu.matmul %235, %2, %cst_54 {dimension_numbers = #tpu.dot_dimension_numbers<[1], [0], [0], [1], [0, 0, 1, 1], [], []>} : vector<8x64xf32>, vector<64x128xf32>, vector<8x128xf32> -> vector<8x128xf32>
    %237 = vector.broadcast %3 : vector<1x128xf32> to vector<8x128xf32>
    %238 = arith.addf %236, %237 : vector<8x128xf32>
    %c0_55 = arith.constant 0 : index
    %c0_56 = arith.constant 0 : index
    %239 = vector.load %arg3[%c0_55, %c0_56] : memref<8x128xf32, #tpu.memory_space<vmem>>, vector<8x128xf32>
    tpu.vector_store %arg3[%c0_55, %c0_56], %238 {strides = array<i32>} : memref<8x128xf32, #tpu.memory_space<vmem>>, vector<8x128xf32>,
    return
  }
}

</mosaic_0001>

<bundles_post_ra>
// kernel: sentiment_gru_forward.1
= control target key start
LH: loop header
LB: loop body
LE: loop exit
PB: predicated region body
PF: predicated region fallthrough
CT: control target
= control target key end

     0   :  { %v1255_v0 = vmov 0.0|0.0   ;;  %vm1256_vm0 = vmmov 0   ;;  %v1257_v4 = vmov 0.0   ;;  %s1258_s22 = smov 64   ;;  %vm32_vm1 = vcmask 261120   ;;  %s1494_s1 = inlined_call_operand.vmem [shape: f32[40,96], index: 1, kind: input, shape index: {}]   ;;  %s1495_s0 = inlined_call_operand.vmem [shape: f32[8,8,96], index: 0, kind: input, shape index: {}]   ;;  %s1496_s2 = inlined_call_operand.vmem [shape: f32[72,128], index: 2, kind: input, shape index: {}]   ;;  %s1497_s3 = inlined_call_operand.vmem [shape: f32[8,128], index: 3, kind: output, shape index: {}]  }
   0x1   :  { %1142 = vmatprep.subr.bf16.mxu1 %v1255_v0  ;;  %v14_v1 = vld [vmem:[%s1494_s1] sm:$0xff]  ;;  %v15_v2 = vld [vmem:[%s1494_s1 + $0x8] sm:$0xff]  ;;  %v16_v3 = vld [vmem:[%s1494_s1 + $0x10] sm:$0xff]  ;;  %1043 = vmatprep.mubr.msk.f32.mxu1 %vm1256_vm0, %v1257_v4  ;;  %vm875_vm2 = vcmask 523520   ;;  %vm882_vm3 = vcmask 523264  }
   0x2   :  { %v1292_v5 = vpack.c.bf16 %v15_v2, %v14_v1  ;;  %v17_v6 = vld [vmem:[%s1494_s1 + $0x18] sm:$0xff]  ;;  %1154 = vmatprep.subr.bf16.mxu0 %v1255_v0  ;;  %1065 = vmatprep.mubr.msk.f32.mxu0 %vm1256_vm0, %v1257_v4  ;;  %v1320_v8 = vld [vmem:[%s1494_s1 + $0x20] ss:$0 sm:$0xff]  ;;  %s1259_s1 = smov 96   ;;  %v964_v32 = vld [vmem:[%s1495_s0 + $0x8] sm:$0xff] }
   0x3   :  { %v1301_v7 = vpack.c.bf16 %v17_v6, %v16_v3  ;;  %v106_v12 = vld [vmem:[%s1495_s0] sm:$0xff]  ;;  %v967_v52 = vld [vmem:[%s1495_s0 + $0x10] sm:$0xff] }
   0x4   :  { %1144 = vmatpush3.bf16.msra.mxu1 %v1292_v5  ;;  %1156 = vmatpush3.bf16.msra.mxu0 %v1292_v5 }
   0x5   :  { %1145 = vmatprep.subr.bf16.mxu1 %v1255_v0  ;;  %1157 = vmatprep.subr.bf16.mxu0 %v1255_v0 }
   0x8   :  { %1147 = vmatpush3.bf16.msra.mxu1 %v1301_v7  ;;  %1159 = vmatpush3.bf16.msra.mxu0 %v1301_v7 }
   0x9   :  { %1148 = vmatprep.subr.bf16.mxu1 %v1255_v0  ;;  %1166 = vmatprep.subr.bf16.mxu0 %v1255_v0 }
   0xb   :  { %1044 = vmatmul.mubr.f32.vlgmr.msra.gmra.mrb[0].mxu1 %v1257_v4 }
   0xc   :  { %1150 = vmatpush3.bf16.msra.mxu1 %v1292_v5  ;;  %1054 = vmatprep.mubr.msk.f32.mxu1 %vm1256_vm0, %v1257_v4 }
   0xd   :  { %1151 = vmatprep.subr.bf16.mxu1 %v1255_v0 }
  0x10   :  { %1153 = vmatpush3.bf16.msra.mxu1 %v1301_v7 }
  0x11   :  { %1160 = vmatprep.subr.bf16.mxu1 %v1255_v0 }
  0xde   :  { %v102_v9 = vpop.f32.mrb[0].mxu1 }
  0xdf   :  { %v103_v10 = vadd.f32 %v1320_v8, %v102_v9  ;;  %v1045_v11 = vpop.f32.mrb[1].mxu1 }
  0xe1   :  { %115 = vrot.lane.b32.xlu0 %v103_v10, %s1258_s22  ;;  %v107_v13 = vadd.f32 %v106_v12, %v103_v10 }
  0xe3   :  { %v962_v14 = vmul.f32 -1.442695, %v107_v13  ;;  %v970_v13 = vld [vmem:[%s1495_s0 + $0x18] sm:$0xff] }
  0xe5   :  { %1207 = vpow2.f32 %v962_v14 }
  0xef   :  { %v1208_v15 = vpop.eup %1207 }
  0xf0   :  { %v111_v16 = vadd.f32 1.0, %v1208_v15 }
  0xf2   :  { %1209 = vrcp.f32 %v111_v16 }
  0xfc   :  { %v1210_v17 = vpop.eup %1209 }
  0xfd   :  { %v125_v23 = vsub.f32 1.0, %v1210_v17  ;;  %v131_v25 = vmul.f32 0.0, %v1210_v17 }
 0x153   :  { %v116_v18 = vpop.permute.xlu0 %115 }
 0x154   :  { %v118_v19 = vmul.f32 %v1210_v17, %v116_v18 }
 0x156   :  { %120 = vrot.lane.b32.xlu0 %v118_v19, %s1258_s22 }
 0x1c8   :  { %v121_v20 = vpop.permute.xlu0 %120 }
 0x1c9   :  { %v123_v21 = vadd.f32 %v121_v20, %v106_v12 }
 0x1cb   :  { %1211 = vtanh.f32 %v123_v21 }
 0x1d5   :  { %v1212_v22 = vpop.eup %1211 }
 0x1d6   :  { %127 = vrot.lane.b32.xlu1 %v1212_v22, %s1259_s1 }
 0x248   :  { %v128_v24 = vpop.permute.xlu1 %127 }
 0x249   :  { %v130_v26 = vmul.f32 %v128_v24, %v125_v23 }
 0x24b   :  { %v1329_v27 = vadd.f32 %v131_v25, %v130_v26 }
 0x24d   :  { %135 = vrot.lane.b32.xlu1 %v1329_v27, %s1259_s1 }
 0x2bf   :  { %v136_v28 = vpop.permute.xlu1 %135 }
 0x2c0   :  { %1055 = vmatmul.mubr.msk.f32.vlgmr.msra.gmra.mrb[2].mxu1 %vm32_vm1, %v136_v28 }
 0x2c1   :  { %1162 = vmatpush3.bf16.msra.mxu1 %v1292_v5  ;;  %1076 = vmatprep.mubr.msk.f32.mxu1 %vm1256_vm0, %v1257_v4 }
 0x2c2   :  { %1163 = vmatprep.subr.bf16.mxu1 %v1255_v0 }
 0x2c5   :  { %1165 = vmatpush3.bf16.msra.mxu1 %v1301_v7 }
 0x2c6   :  { %1172 = vmatprep.subr.bf16.mxu1 %v1255_v0 }
 0x393   :  { %v205_v29 = vpop.f32.mrb[2].mxu1 }
 0x394   :  { %v206_v30 = vadd.f32 %v1320_v8, %v205_v29  ;;  %v1056_v31 = vpop.f32.mrb[3].mxu1 }
 0x396   :  { %219 = vrot.lane.b32.xlu0 %v206_v30, %s1258_s22  ;;  %v211_v33 = vadd.f32 %v964_v32, %v206_v30 }
 0x398   :  { %v965_v34 = vmul.f32 -1.442695, %v211_v33 }
 0x39a   :  { %1213 = vpow2.f32 %v965_v34  ;;  %v973_v34 = vld [vmem:[%s1495_s0 + $0x20] sm:$0xff] }
 0x3a4   :  { %v1214_v35 = vpop.eup %1213 }
 0x3a5   :  { %v215_v36 = vadd.f32 1.0, %v1214_v35 }
 0x3a7   :  { %1215 = vrcp.f32 %v215_v36 }
 0x3b1   :  { %v1216_v37 = vpop.eup %1215 }
 0x3b2   :  { %v229_v43 = vsub.f32 1.0, %v1216_v37  ;;  %v235_v45 = vmul.f32 %v1216_v37, %v1329_v27 }
 0x408   :  { %v220_v38 = vpop.permute.xlu0 %219 }
 0x409   :  { %v222_v39 = vmul.f32 %v1216_v37, %v220_v38 }
 0x40b   :  { %224 = vrot.lane.b32.xlu1 %v222_v39, %s1258_s22 }
 0x47d   :  { %v225_v40 = vpop.permute.xlu1 %224 }
 0x47e   :  { %v227_v41 = vadd.f32 %v964_v32, %v225_v40 }
 0x480   :  { %1217 = vtanh.f32 %v227_v41 }
 0x48a   :  { %v1218_v42 = vpop.eup %1217 }
 0x48b   :  { %231 = vrot.lane.b32.xlu0 %v1218_v42, %s1259_s1 }
 0x4fd   :  { %v232_v44 = vpop.permute.xlu0 %231 }
 0x4fe   :  { %v234_v46 = vmul.f32 %v232_v44, %v229_v43 }
 0x500   :  { %v1348_v47 = vadd.f32 %v235_v45, %v234_v46 }
 0x502   :  { %240 = vrot.lane.b32.xlu1 %v1348_v47, %s1259_s1 }
 0x574   :  { %v241_v48 = vpop.permute.xlu1 %240 }
 0x575   :  { %1066 = vmatmul.mubr.msk.f32.vlgmr.msra.gmra.mrb[0].mxu0 %vm32_vm1, %v241_v48 }
 0x576   :  { %1168 = vmatpush3.bf16.msra.mxu0 %v1292_v5  ;;  %1087 = vmatprep.mubr.msk.f32.mxu0 %vm1256_vm0, %v1257_v4 }
 0x577   :  { %1169 = vmatprep.subr.bf16.mxu0 %v1255_v0 }
 0x57a   :  { %1171 = vmatpush3.bf16.msra.mxu0 %v1301_v7 }
 0x57b   :  { %1178 = vmatprep.subr.bf16.mxu0 %v1255_v0 }
 0x648   :  { %v310_v49 = vpop.f32.mrb[0].mxu0 }
 0x649   :  { %v311_v50 = vadd.f32 %v1320_v8, %v310_v49  ;;  %v1067_v51 = vpop.f32.mrb[1].mxu0 }
 0x64b   :  { %324 = vrot.lane.b32.xlu0 %v311_v50, %s1258_s22  ;;  %v316_v53 = vadd.f32 %v967_v52, %v311_v50 }
 0x64d   :  { %v968_v54 = vmul.f32 -1.442695, %v316_v53 }
 0x64f   :  { %1219 = vpow2.f32 %v968_v54 }
 0x659   :  { %v1220_v55 = vpop.eup %1219 }
 0x65a   :  { %v320_v56 = vadd.f32 1.0, %v1220_v55  ;;  %v976_v55 = vld [vmem:[%s1495_s0 + $0x28] sm:$0xff] }
 0x65c   :  { %1221 = vrcp.f32 %v320_v56 }
 0x666   :  { %v1222_v57 = vpop.eup %1221 }
 0x667   :  { %v334_v63 = vsub.f32 1.0, %v1222_v57  ;;  %v340_v2 = vmul.f32 %v1222_v57, %v1348_v47 }
 0x6bd   :  { %v325_v58 = vpop.permute.xlu0 %324 }
 0x6be   :  { %v327_v59 = vmul.f32 %v1222_v57, %v325_v58 }
 0x6c0   :  { %329 = vrot.lane.b32.xlu1 %v327_v59, %s1258_s22 }
 0x732   :  { %v330_v60 = vpop.permute.xlu1 %329 }
 0x733   :  { %v332_v61 = vadd.f32 %v967_v52, %v330_v60 }
 0x735   :  { %1223 = vtanh.f32 %v332_v61 }
 0x73f   :  { %v1224_v62 = vpop.eup %1223 }
 0x740   :  { %336 = vrot.lane.b32.xlu0 %v1224_v62, %s1259_s1 }
 0x7b2   :  { %v337_v1 = vpop.permute.xlu0 %336 }
 0x7b3   :  { %v339_v3 = vmul.f32 %v337_v1, %v334_v63 }
 0x7b5   :  { %v1367_v6 = vadd.f32 %v340_v2, %v339_v3 }
 0x7b7   :  { %345 = vrot.lane.b32.xlu1 %v1367_v6, %s1259_s1 }
 0x829   :  { %v346_v9 = vpop.permute.xlu1 %345 }
 0x82a   :  { %1077 = vmatmul.mubr.msk.f32.vlgmr.msra.gmra.mrb[4].mxu1 %vm32_vm1, %v346_v9 }
 0x82b   :  { %1174 = vmatpush3.bf16.msra.mxu1 %v1292_v5  ;;  %1098 = vmatprep.mubr.msk.f32.mxu1 %vm1256_vm0, %v1257_v4 }
 0x82c   :  { %1175 = vmatprep.subr.bf16.mxu1 %v1255_v0 }
 0x82f   :  { %1177 = vmatpush3.bf16.msra.mxu1 %v1301_v7 }
 0x830   :  { %1184 = vmatprep.subr.bf16.mxu1 %v1255_v0 }
 0x8fd   :  { %v415_v10 = vpop.f32.mrb[4].mxu1 }
 0x8fe   :  { %v416_v11 = vadd.f32 %v1320_v8, %v415_v10  ;;  %v1078_v12 = vpop.f32.mrb[5].mxu1 }
 0x900   :  { %429 = vrot.lane.b32.xlu0 %v416_v11, %s1258_s22  ;;  %v421_v14 = vadd.f32 %v970_v13, %v416_v11 }
 0x902   :  { %v971_v15 = vmul.f32 -1.442695, %v421_v14 }
 0x904   :  { %1225 = vpow2.f32 %v971_v15  ;;  %v979_v15 = vld [vmem:[%s1495_s0 + $0x30] sm:$0xff] }
 0x90e   :  { %v1226_v16 = vpop.eup %1225 }
 0x90f   :  { %v425_v17 = vadd.f32 1.0, %v1226_v16 }
 0x911   :  { %1227 = vrcp.f32 %v425_v17 }
 0x91b   :  { %v1228_v18 = vpop.eup %1227 }
 0x91c   :  { %v439_v24 = vsub.f32 1.0, %v1228_v18  ;;  %v445_v26 = vmul.f32 %v1228_v18, %v1367_v6 }
 0x972   :  { %v430_v19 = vpop.permute.xlu0 %429 }
 0x973   :  { %v432_v20 = vmul.f32 %v1228_v18, %v430_v19 }
 0x975   :  { %434 = vrot.lane.b32.xlu1 %v432_v20, %s1258_s22 }
 0x9e7   :  { %v435_v21 = vpop.permute.xlu1 %434 }
 0x9e8   :  { %v437_v22 = vadd.f32 %v970_v13, %v435_v21 }
 0x9ea   :  { %1229 = vtanh.f32 %v437_v22 }
 0x9f4   :  { %v1230_v23 = vpop.eup %1229 }
 0x9f5   :  { %441 = vrot.lane.b32.xlu0 %v1230_v23, %s1259_s1 }
 0xa67   :  { %v442_v25 = vpop.permute.xlu0 %441 }
 0xa68   :  { %v444_v28 = vmul.f32 %v442_v25, %v439_v24 }
 0xa6a   :  { %v1386_v29 = vadd.f32 %v445_v26, %v444_v28 }
 0xa6c   :  { %450 = vrot.lane.b32.xlu1 %v1386_v29, %s1259_s1 }
 0xade   :  { %v451_v30 = vpop.permute.xlu1 %450 }
 0xadf   :  { %1088 = vmatmul.mubr.msk.f32.vlgmr.msra.gmra.mrb[2].mxu0 %vm32_vm1, %v451_v30 }
 0xae0   :  { %1180 = vmatpush3.bf16.msra.mxu0 %v1292_v5  ;;  %1109 = vmatprep.mubr.msk.f32.mxu0 %vm1256_vm0, %v1257_v4 }
 0xae1   :  { %1181 = vmatprep.subr.bf16.mxu0 %v1255_v0 }
 0xae4   :  { %1183 = vmatpush3.bf16.msra.mxu0 %v1301_v7 }
 0xae5   :  { %1190 = vmatprep.subr.bf16.mxu0 %v1255_v0 }
 0xbb2   :  { %v520_v31 = vpop.f32.mrb[2].mxu0 }
 0xbb3   :  { %v521_v32 = vadd.f32 %v1320_v8, %v520_v31  ;;  %v1089_v33 = vpop.f32.mrb[3].mxu0 }
 0xbb5   :  { %534 = vrot.lane.b32.xlu0 %v521_v32, %s1258_s22  ;;  %v526_v35 = vadd.f32 %v973_v34, %v521_v32 }
 0xbb7   :  { %v974_v36 = vmul.f32 -1.442695, %v526_v35 }
 0xbb9   :  { %1231 = vpow2.f32 %v974_v36  ;;  %v982_v36 = vld [vmem:[%s1495_s0 + $0x38] sm:$0xff] }
 0xbc3   :  { %v1232_v37 = vpop.eup %1231 }
 0xbc4   :  { %v530_v38 = vadd.f32 1.0, %v1232_v37 }
 0xbc6   :  { %1233 = vrcp.f32 %v530_v38 }
 0xbd0   :  { %v1234_v39 = vpop.eup %1233 }
 0xbd1   :  { %v544_v45 = vsub.f32 1.0, %v1234_v39  ;;  %v550_v48 = vmul.f32 %v1234_v39, %v1386_v29 }
 0xc27   :  { %v535_v40 = vpop.permute.xlu0 %534 }
 0xc28   :  { %v537_v41 = vmul.f32 %v1234_v39, %v535_v40 }
 0xc2a   :  { %539 = vrot.lane.b32.xlu1 %v537_v41, %s1258_s22 }
 0xc9c   :  { %v540_v42 = vpop.permute.xlu1 %539 }
 0xc9d   :  { %v542_v43 = vadd.f32 %v973_v34, %v540_v42 }
 0xc9f   :  { %1235 = vtanh.f32 %v542_v43 }
 0xca9   :  { %v1236_v44 = vpop.eup %1235 }
 0xcaa   :  { %546 = vrot.lane.b32.xlu0 %v1236_v44, %s1259_s1 }
 0xd1c   :  { %v547_v46 = vpop.permute.xlu0 %546 }
 0xd1d   :  { %v549_v49 = vmul.f32 %v547_v46, %v544_v45  ;;  %v19_v45 = vld [vmem:[%s1496_s2] sm:$0xff]  ;;  %v20_v46 = vld [vmem:[%s1496_s2 + $0x8] sm:$0xff] }
 0xd1f   :  { %v1405_v50 = vadd.f32 %v550_v48, %v549_v49  ;;  %v21_v48 = vld [vmem:[%s1496_s2 + $0x10] sm:$0xff]  ;;  %v1191_v49 = vpack.c.bf16 %v20_v46, %v19_v45 }
 0xd21   :  { %555 = vrot.lane.b32.xlu1 %v1405_v50, %s1259_s1 }
 0xd93   :  { %v556_v51 = vpop.permute.xlu1 %555 }
 0xd94   :  { %1099 = vmatmul.mubr.msk.f32.vlgmr.msra.gmra.mrb[6].mxu1 %vm32_vm1, %v556_v51  ;;  %v22_v51 = vld [vmem:[%s1496_s2 + $0x18] sm:$0xff] }
 0xd95   :  { %1186 = vmatpush3.bf16.msra.mxu1 %v1292_v5  ;;  %1120 = vmatprep.mubr.msk.f32.mxu1 %vm1256_vm0, %v1257_v4 }
 0xd96   :  { %1187 = vmatprep.subr.bf16.mxu1 %v1255_v0 }
 0xd99   :  { %1189 = vmatpush3.bf16.msra.mxu1 %v1301_v7 }
 0xe67   :  { %v625_v52 = vpop.f32.mrb[6].mxu1 }
 0xe68   :  { %v626_v53 = vadd.f32 %v1320_v8, %v625_v52  ;;  %v1100_v54 = vpop.f32.mrb[7].mxu1  ;;  %v1194_v52 = vpack.c.bf16 %v22_v51, %v21_v48 }
 0xe69   :  { %v237_v54 = vmax.f32 %v1329_v27, %v1348_v47 }
 0xe6a   :  { %639 = vrot.lane.b32.xlu0 %v626_v53, %s1258_s22  ;;  %v631_v56 = vadd.f32 %v976_v55, %v626_v53 }
 0xe6c   :  { %v977_v57 = vmul.f32 -1.442695, %v631_v56  ;;  %v24_v56 = vld [vmem:[%s1496_s2 + $0x28] sm:$0xff] }
 0xe6e   :  { %1237 = vpow2.f32 %v977_v57 }
 0xe78   :  { %v1238_v5 = vpop.eup %1237 }
 0xe79   :  { %v635_v58 = vadd.f32 1.0, %v1238_v5  ;;  %v342_v5 = vmax.f32 %v237_v54, %v1367_v6 }
 0xe7b   :  { %1239 = vrcp.f32 %v635_v58  ;;  %v25_v58 = vld [vmem:[%s1496_s2 + $0x30] sm:$0xff] }
 0xe85   :  { %v1240_v59 = vpop.eup %1239 }
 0xe86   :  { %v649_v1 = vsub.f32 1.0, %v1240_v59  ;;  %v655_v3 = vmul.f32 %v1240_v59, %v1405_v50 }
 0xedc   :  { %v640_v60 = vpop.permute.xlu0 %639 }
 0xedd   :  { %v642_v61 = vmul.f32 %v1240_v59, %v640_v60  ;;  %v26_v59 = vld [vmem:[%s1496_s2 + $0x38] sm:$0xff] }
 0xede   :  { %v1200_v60 = vpack.c.bf16 %v26_v59, %v25_v58 }
 0xedf   :  { %644 = vrot.lane.b32.xlu1 %v642_v61, %s1258_s22  ;;  %v447_v61 = vmax.f32 %v342_v5, %v1386_v29 }
 0xf51   :  { %v645_v7 = vpop.permute.xlu1 %644 }
 0xf52   :  { %v647_v62 = vadd.f32 %v976_v55, %v645_v7  ;;  %v23_v55 = vld [vmem:[%s1496_s2 + $0x20] sm:$0xff] }
 0xf53   :  { %v1197_v57 = vpack.c.bf16 %v24_v56, %v23_v55 }
 0xf54   :  { %1241 = vtanh.f32 %v647_v62  ;;  %v552_v62 = vmax.f32 %v447_v61, %v1405_v50 }
 0xf5e   :  { %v1242_v63 = vpop.eup %1241 }
 0xf5f   :  { %651 = vrot.lane.b32.xlu0 %v1242_v63, %s1259_s1 }
 0xfd1   :  { %v652_v2 = vpop.permute.xlu0 %651 }
 0xfd2   :  { %v654_v9 = vmul.f32 %v652_v2, %v649_v1 }
 0xfd4   :  { %v1423_v10 = vadd.f32 %v655_v3, %v654_v9 }
 0xfd6   :  { %660 = vrot.lane.b32.xlu1 %v1423_v10, %s1259_s1  ;;  %v657_v3 = vmax.f32 %v552_v62, %v1423_v10 }
0x1048   :  { %v661_v11 = vpop.permute.xlu1 %660 }
0x1049   :  { %1110 = vmatmul.mubr.msk.f32.vlgmr.msra.gmra.mrb[4].mxu0 %vm32_vm1, %v661_v11 }
0x104a   :  { %1139 = vmatprep.mubr.msk.f32.mxu0 %vm1256_vm0, %v1257_v4  ;;  %1192 = vmatpush3.bf16.msra.mxu0 %v1191_v49 }
0x104b   :  { %1193 = vmatprep.subr.bf16.mxu0 %v1255_v0 }
0x104e   :  { %1195 = vmatpush3.bf16.msra.mxu0 %v1194_v52 }
0x104f   :  { %1196 = vmatprep.subr.bf16.mxu0 %v1255_v0 }
0x1052   :  { %1198 = vmatpush3.bf16.msra.mxu0 %v1197_v57 }
0x1053   :  { %1199 = vmatprep.subr.bf16.mxu0 %v1255_v0 }
0x1056   :  { %1201 = vmatpush3.bf16.msra.mxu0 %v1200_v60 }
0x111c   :  { %v730_v12 = vpop.f32.mrb[4].mxu0 }
0x111d   :  { %v731_v13 = vadd.f32 %v1320_v8, %v730_v12  ;;  %v1111_v14 = vpop.f32.mrb[5].mxu0 }
0x111f   :  { %744 = vrot.lane.b32.xlu0 %v731_v13, %s1258_s22  ;;  %v736_v16 = vadd.f32 %v979_v15, %v731_v13  ;;  %v238_v13 = vadd.f32 %v1348_v47, %v1329_v27  ;;  %v984_v27 = vld [vmem:[%s1496_s2 + $0x40] ss:$0 sm:$0xff] }
0x1121   :  { %v980_v17 = vmul.f32 -1.442695, %v736_v16  ;;  %v343_v14 = vadd.f32 %v1367_v6, %v238_v13 }
0x1123   :  { %1243 = vpow2.f32 %v980_v17  ;;  %v448_v0 = vadd.f32 %v1386_v29, %v343_v14 }
0x112d   :  { %v1244_v18 = vpop.eup %1243 }
0x112e   :  { %v740_v19 = vadd.f32 1.0, %v1244_v18 }
0x1130   :  { %1245 = vrcp.f32 %v740_v19 }
0x113a   :  { %v1246_v20 = vpop.eup %1245 }
0x113b   :  { %v754_v25 = vsub.f32 1.0, %v1246_v20  ;;  %v760_v28 = vmul.f32 %v1246_v20, %v1423_v10 }
0x1191   :  { %v745_v21 = vpop.permute.xlu0 %744 }
0x1192   :  { %v747_v22 = vmul.f32 %v1246_v20, %v745_v21 }
0x1194   :  { %749 = vrot.lane.b32.xlu1 %v747_v22, %s1258_s22 }
0x1206   :  { %v750_v4 = vpop.permute.xlu1 %749 }
0x1207   :  { %v752_v23 = vadd.f32 %v979_v15, %v750_v4  ;;  %v553_v15 = vadd.f32 %v1405_v50, %v448_v0 }
0x1209   :  { %1247 = vtanh.f32 %v752_v23  ;;  %v658_v16 = vadd.f32 %v1423_v10, %v553_v15 }
0x1213   :  { %v1248_v24 = vpop.eup %1247 }
0x1214   :  { %756 = vrot.lane.b32.xlu0 %v1248_v24, %s1259_s1 }
0x1286   :  { %v757_v26 = vpop.permute.xlu0 %756 }
0x1287   :  { %v759_v30 = vmul.f32 %v757_v26, %v754_v25 }
0x1289   :  { %v761_v31 = vadd.f32 %v760_v28, %v759_v30 }
0x128b   :  { %765 = vrot.lane.b32.xlu1 %v761_v31, %s1259_s1  ;;  %v762_v11 = vmax.f32 %v657_v3, %v761_v31  ;;  %v763_v17 = vadd.f32 %v761_v31, %v658_v16 }
0x12fd   :  { %v766_v32 = vpop.permute.xlu1 %765 }
0x12fe   :  { %1121 = vmatmul.mubr.msk.f32.vlgmr.msra.gmra.mrb[8].mxu1 %vm32_vm1, %v766_v32 }
0x13d1   :  { %v835_v33 = vpop.f32.mrb[8].mxu1 }
0x13d2   :  { %v836_v34 = vadd.f32 %v1320_v8, %v835_v33  ;;  %v1122_v35 = vpop.f32.mrb[9].mxu1 }
0x13d4   :  { %849 = vrot.lane.b32.xlu0 %v836_v34, %s1258_s22  ;;  %v841_v37 = vadd.f32 %v982_v36, %v836_v34 }
0x13d6   :  { %v983_v38 = vmul.f32 -1.442695, %v841_v37 }
0x13d8   :  { %1249 = vpow2.f32 %v983_v38 }
0x13e2   :  { %v1250_v39 = vpop.eup %1249 }
0x13e3   :  { %v845_v40 = vadd.f32 1.0, %v1250_v39 }
0x13e5   :  { %1251 = vrcp.f32 %v845_v40 }
0x13ef   :  { %v1252_v41 = vpop.eup %1251 }
0x13f0   :  { %v859_v7 = vsub.f32 1.0, %v1252_v41  ;;  %v865_v1 = vmul.f32 %v1252_v41, %v761_v31 }
0x1446   :  { %v850_v42 = vpop.permute.xlu0 %849 }
0x1447   :  { %v852_v43 = vmul.f32 %v1252_v41, %v850_v42 }
0x1449   :  { %854 = vrot.lane.b32.xlu1 %v852_v43, %s1258_s22 }
0x14bb   :  { %v855_v44 = vpop.permute.xlu1 %854 }
0x14bc   :  { %v857_v8 = vadd.f32 %v982_v36, %v855_v44 }
0x14be   :  { %1253 = vtanh.f32 %v857_v8 }
0x14c8   :  { %v1254_v53 = vpop.eup %1253 }
0x14c9   :  { %861 = vrot.lane.b32.xlu0 %v1254_v53, %s1259_s1 }
0x153b   :  { %v862_v63 = vpop.permute.xlu0 %861 }
0x153c   :  { %v864_v2 = vmul.f32 %v862_v63, %v859_v7 }
0x153e   :  { %v866_v9 = vadd.f32 %v865_v1, %v864_v2 }
0x1540   :  { %v867_v12 = vmax.f32 %v762_v11, %v866_v9  ;;  %v868_v18 = vadd.f32 %v866_v9, %v763_v17 }
0x1542   :  { %870 = vrot.lane.b32.xlu1 %v867_v12, %s1259_s1  ;;  %v874_v19 = vmul.f32 0.125, %v868_v18 }
0x15b4   :  { %v871_v20 = vpop.permute.xlu1 %870 }
0x15b5   :  { %873 = vst.msk [vmem:[#allocation2] sm:$0xff] %vm32_vm1, %v871_v20 }
0x15b6   :  { %876 = vst.msk [vmem:[#allocation2] sm:$0xff] %vm875_vm2, %v874_v19 }
0x15bd   :  { %v877_v21 = vld [vmem:[#allocation2] sm:$0xff] }
0x15be   :  { %1140 = vmatmul.mubr.msk.f32.vlgmr.msra.gmra.mrb[6].mxu0 %vm882_vm3, %v877_v21 }
0x1691   :  { %v952_v47 = vpop.f32.mrb[6].mxu0 }
0x1692   :  { %v953_v6 = vadd.f32 %v984_v27, %v952_v47  ;;  %v1141_v29 = vpop.f32.mrb[7].mxu0 }
0x1694   :  { %956 = vst [vmem:[%s1497_s3] sm:$0xff] %v953_v6 }

</bundles_post_ra>
